<compile_context>
chip_gen: v7x
topology: tpu7x:2x2x1
jax: 0.10.0
libtpu: 0.0.40
codegen_flags: <defaults>
</compile_context>

<pallas_src>
import math
import functools

import jax
import jax.numpy as jnp
import numpy as np
from jax import lax
from jax.experimental import pallas as pl
from jax.experimental.pallas import tpu as pltpu


def _swap_halves(t, head_dim):
    """concat(t2, t1) along the last dim (the rotate_half sign is folded into sin)."""
    half = head_dim // 2
    if head_dim % 128 == 0:
        # Lane-aligned head dim (real models: head_dim=128): a cyclic roll by half
        # == swap of the halves; runs on the XLU slot instead of masked slice+concat.
        return pltpu.roll(t, half, axis=-1)
    return jnp.concatenate([t[:, half:], t[:, :half]], axis=-1)


def _rmsnorm(h, w, eps):
    var = jnp.mean(h * h, axis=-1, keepdims=True)
    return (h * lax.rsqrt(var + eps)) * w


def _pick_vmem_limit():
    # Per-generation VMEM budget: ~48 MiB on v7x (64 MiB physical), ~96 MiB on
    # v5e/v6e (128 MiB physical); conservative fallback if the query fails.
    try:
        cap = int(pltpu.get_tpu_info().vmem_capacity_bytes)
    except Exception:
        cap = 64 * 1024 * 1024
    return min((cap * 3) // 4, 100 * 1024 * 1024)


# ---------------------------------------------------------------------------
# Kernel 1: RMSNorm + fused K|V projection + K RoPE  (grid = (B, S_tiles))
# ---------------------------------------------------------------------------
def _kv_kernel(x_ref, ln1_ref, wkv_ref, cos_ref, sin_ref, k_ref, v_ref,
               *, num_kv_heads, head_dim, eps):
    f32, bf16 = jnp.float32, jnp.bfloat16
    hkv = num_kv_heads * head_dim

    x = x_ref[0]                                              # (ts, H) fp32
    xn = _rmsnorm(x, ln1_ref[...], eps).astype(bf16)
    # One fused (ts,H)@(H,2*Hkv) MXU GEMM for K and V.
    kv = jnp.dot(xn, wkv_ref[...], preferred_element_type=f32)

    cos = cos_ref[...]                                        # (ts, hd)
    sin = sin_ref[...]                                        # rotate_half sign folded in
    for g in range(num_kv_heads):
        kh = kv[:, g * head_dim:(g + 1) * head_dim]
        kh = kh * cos + _swap_halves(kh, head_dim) * sin
        k_ref[0, g] = kh.astype(bf16)
        v_ref[0, g] = kv[:, hkv + g * head_dim: hkv + (g + 1) * head_dim].astype(bf16)


# ---------------------------------------------------------------------------
# Kernel 2: attention (Q path) + output proj + SwiGLU MLP  (grid = (B, q_tiles))
# ---------------------------------------------------------------------------
def _attn_mlp_kernel(x_ref, k_ref, v_ref, ln1_ref, wq_ref, wo_ref, ln2_ref,
                     wgu_ref, wd_ref, cos_q_ref, sin_q_ref, o_ref, o_scr,
                     *, num_heads, num_kv_heads, head_dim, inter, eps):
    f32, bf16 = jnp.float32, jnp.bfloat16
    n_rep = num_heads // num_kv_heads

    x_q = x_ref[0]                                            # (tq, H) fp32
    xn_q = _rmsnorm(x_q, ln1_ref[...], eps)
    q = jnp.dot(xn_q.astype(bf16), wq_ref[...], preferred_element_type=f32)

    cos_q = cos_q_ref[...]                                    # 1/sqrt(hd) folded in
    sin_q = sin_q_ref[...]                                    # sign * 1/sqrt(hd) folded in

    # TODO(synk): at production head counts / sequence lengths, convert this to a
    # lax.fori_loop and chunk the KV dimension flash-style (online max/sum, K/V
    # streamed per chunk) so VMEM stays bounded independently of S.
    for h in range(num_heads):
        g = h // n_rep                                        # GQA repeat_kv mapping
        qh = q[:, h * head_dim:(h + 1) * head_dim]
        qh = (qh * cos_q + _swap_halves(qh, head_dim) * sin_q).astype(bf16)
        kh = k_ref[0, g]                                      # (S, hd) bf16, RoPE'd
        vh = v_ref[0, g]
        # scores: contract the last dims (no explicit kh.T / XLU transpose)
        s = lax.dot_general(qh, kh, (((1,), (1,)), ((), ())),
                            preferred_element_type=f32)       # (tq, S)
        s = s - jnp.max(s, axis=-1, keepdims=True)
        p = jnp.exp(s)
        inv = pl.reciprocal(jnp.sum(p, axis=-1, keepdims=True), approx=True)
        oh = jnp.dot(p.astype(bf16), vh, preferred_element_type=f32)   # (tq, hd)
        # normalize the (tq, hd) output rather than the (tq, S) probabilities,
        # then write into the per-head column slot (no concat / relayout).
        o_scr[:, h * head_dim:(h + 1) * head_dim] = (oh * inv).astype(bf16)

    # Single full-depth output projection GEMM (K = num_heads*head_dim).
    attn = jnp.dot(o_scr[...], wo_ref[...], preferred_element_type=f32)
    h1 = x_q + attn                                           # residual add

    # TODO(synk): source module's `act_fn(self.gate_proj * self.up_proj(x))` is not
    # executable as written; implemented canonical Llama MLP down(silu(gate(x)) * up(x)).
    hn = _rmsnorm(h1, ln2_ref[...], eps).astype(bf16)
    gu = jnp.dot(hn, wgu_ref[...], preferred_element_type=f32)    # fused gate|up GEMM
    gate = gu[:, :inter]
    up = gu[:, inter:]
    mlp = jnp.dot((gate * jax.nn.sigmoid(gate) * up).astype(bf16), wd_ref[...],
                  preferred_element_type=f32)

    o_ref[0] = (h1 + mlp).astype(o_ref.dtype)


# ---------------------------------------------------------------------------
# Wrapper
# ---------------------------------------------------------------------------
def llama_decoder_layer(x, params, cos, sin, *, num_heads, num_kv_heads,
                        eps=1e-6, q_tile=256, s_tile=256):
    B, S, H = x.shape
    head_dim = H // num_heads
    Hq = num_heads * head_dim
    Hkv = num_kv_heads * head_dim
    inter = params["wg"].shape[1]
    sm_scale = 1.0 / math.sqrt(head_dim)

    tq = min(q_tile, S)
    ts = min(s_tile, S)
    assert S % tq == 0 and S % ts == 0, "sequence length must be divisible by tiles"
    nq, ns = S // tq, S // ts

    bf16, f32 = jnp.bfloat16, jnp.float32
    # bf16 MXU operands (fp32 accumulation inside the kernels); fused weights.
    wq = params["wq"].astype(bf16)
    wkv = jnp.concatenate([params["wk"], params["wv"]], axis=1).astype(bf16)
    wo = params["wo"].astype(bf16)
    wgu = jnp.concatenate([params["wg"], params["wu"]], axis=1).astype(bf16)
    wd = params["wd"].astype(bf16)
    ln1 = params["ln1"].astype(f32)
    ln2 = params["ln2"].astype(f32)

    # Pre-fold the rotate_half sign (and, for Q, the 1/sqrt(hd) score scale) into
    # the rotary tables host-side: no in-kernel iota/sign/per-step table scaling.
    sign = jnp.where(jnp.arange(head_dim) < head_dim // 2, -1.0, 1.0).astype(f32)
    cos_f = cos.astype(f32)
    sin_f = sin.astype(f32) * sign[None, :]
    cos_q = cos_f * sm_scale
    sin_q = sin_f * sm_scale

    vmem_limit = _pick_vmem_limit()

    def const_spec(shape):
        # Grid-invariant operand (weights / norm scales): constant index_map, DMA'd
        # once and kept resident across the grid.
        # TODO(synk): mark with pipeline_mode=pl.Buffered(1) to drop the unused second
        # buffer once single-buffered invariant operands are supported.
        zero = (0,) * len(shape)
        return pl.BlockSpec(shape, lambda *args: zero)

    # ---------------- kernel 1: K/V projection + RoPE ----------------
    flops_kv = 2 * B * S * H * (2 * Hkv)
    bytes_kv = (B * S * H * 4 + H * 2 * Hkv * 2 + 2 * S * head_dim * 4
                + 2 * B * S * Hkv * 2)
    kv_call = pl.pallas_call(
        functools.partial(_kv_kernel, num_kv_heads=num_kv_heads,
                          head_dim=head_dim, eps=eps),
        out_shape=(jax.ShapeDtypeStruct((B, num_kv_heads, S, head_dim), bf16),
                   jax.ShapeDtypeStruct((B, num_kv_heads, S, head_dim), bf16)),
        grid=(B, ns),
        in_specs=[
            pl.BlockSpec((1, ts, H), lambda b, s: (b, s, 0)),        # x, S tile
            const_spec((1, H)),                                      # ln1 weight
            const_spec((H, 2 * Hkv)),                                # concat(Wk, Wv)
            pl.BlockSpec((ts, head_dim), lambda b, s: (s, 0)),       # cos
            pl.BlockSpec((ts, head_dim), lambda b, s: (s, 0)),       # sin (sign folded)
        ],
        out_specs=(
            pl.BlockSpec((1, num_kv_heads, ts, head_dim), lambda b, s: (b, 0, s, 0)),
            pl.BlockSpec((1, num_kv_heads, ts, head_dim), lambda b, s: (b, 0, s, 0)),
        ),
        compiler_params=pltpu.CompilerParams(
            dimension_semantics=("parallel", "parallel"),
            vmem_limit_bytes=vmem_limit,
        ),
        cost_estimate=pl.CostEstimate(flops=flops_kv, transcendentals=B * S,
                                      bytes_accessed=bytes_kv),
    )
    k_rope, v_cache = kv_call(x, ln1, wkv, cos_f, sin_f)

    # ---------------- kernel 2: attention + output proj + MLP ----------------
    # TODO(synk): at production Llama sizes (H=4096, I=14336) wgu/wd/wq/wo should be
    # tiled along N/K with extra grid axes (or streamed via pltpu.emit_pipeline), and
    # K/V streamed flash-style, to fit v7x's 64 MiB VMEM; unnecessary at these shapes.
    flops_attn = (2 * B * S * H * Hq
                  + 4 * B * num_heads * S * S * head_dim      # scores + PV
                  + 2 * B * S * Hq * H
                  + 2 * B * S * H * (2 * inter)
                  + 2 * B * S * inter * H)
    trans_attn = B * num_heads * S * S + B * S * inter
    bytes_attn = (B * S * H * 4
                  + 2 * B * Hkv * S * 2
                  + (H * Hq + Hq * H + H * 2 * inter + inter * H) * 2
                  + 2 * H * 4 + 2 * S * head_dim * 4
                  + B * S * H * 4)
    attn_call = pl.pallas_call(
        functools.partial(_attn_mlp_kernel, num_heads=num_heads,
                          num_kv_heads=num_kv_heads, head_dim=head_dim,
                          inter=inter, eps=eps),
        out_shape=jax.ShapeDtypeStruct((B, S, H), x.dtype),
        grid=(B, nq),
        in_specs=[
            pl.BlockSpec((1, tq, H), lambda b, t: (b, t, 0)),        # x, q tile
            pl.BlockSpec((1, num_kv_heads, S, head_dim), lambda b, t: (b, 0, 0, 0)),  # K
            pl.BlockSpec((1, num_kv_heads, S, head_dim), lambda b, t: (b, 0, 0, 0)),  # V
            const_spec((1, H)),                                      # ln1 weight
            const_spec((H, Hq)),                                     # wq
            const_spec((Hq, H)),                                     # wo
            const_spec((1, H)),                                      # ln2 weight
            const_spec((H, 2 * inter)),                              # concat(Wg, Wu)
            const_spec((inter, H)),                                  # wd
            pl.BlockSpec((tq, head_dim), lambda b, t: (t, 0)),       # cos (scale folded)
            pl.BlockSpec((tq, head_dim), lambda b, t: (t, 0)),       # sin (sign+scale)
        ],
        out_specs=pl.BlockSpec((1, tq, H), lambda b, t: (b, t, 0)),
        scratch_shapes=[pltpu.VMEM((tq, Hq), bf16)],                 # per-head attn out
        compiler_params=pltpu.CompilerParams(
            # No cross-iteration state -> both axes parallel (v7x megacore can
            # split the q axis even when B is 1 / odd).
            dimension_semantics=("parallel", "parallel"),
            vmem_limit_bytes=vmem_limit,
        ),
        cost_estimate=pl.CostEstimate(flops=flops_attn, transcendentals=trans_attn,
                                      bytes_accessed=bytes_attn),
    )
    return attn_call(x, k_rope, v_cache, ln1, wq, wo, ln2, wgu, wd, cos_q, sin_q)


# ---------------- pure-JAX fp32 reference (mirrors the torch module) ----------------
def reference(x, params, cos, sin, *, num_heads, num_kv_heads, eps=1e-6):
    B, S, H = x.shape
    hd = H // num_heads
    n_rep = num_heads // num_kv_heads

    def rmsnorm(h, w):
        var = jnp.mean(h * h, axis=-1, keepdims=True)
        return (h * lax.rsqrt(var + eps)) * w[0]

    def rot_half(t):
        t1, t2 = t[..., : hd // 2], t[..., hd // 2:]
        return jnp.concatenate([-t2, t1], axis=-1)

    xn = rmsnorm(x, params["ln1"])
    q = (xn @ params["wq"]).reshape(B, S, num_heads, hd).transpose(0, 2, 1, 3)
    k = (xn @ params["wk"]).reshape(B, S, num_kv_heads, hd).transpose(0, 2, 1, 3)
    v = (xn @ params["wv"]).reshape(B, S, num_kv_heads, hd).transpose(0, 2, 1, 3)
    c = cos[None, None]
    s = sin[None, None]
    q = q * c + rot_half(q) * s
    k = k * c + rot_half(k) * s
    k = jnp.repeat(k, n_rep, axis=1)
    v = jnp.repeat(v, n_rep, axis=1)
    w = jnp.einsum("bhqd,bhkd->bhqk", q, k) / math.sqrt(hd)
    w = jax.nn.softmax(w, axis=-1)
    attn = jnp.einsum("bhqk,bhkd->bhqd", w, v)
    attn = attn.transpose(0, 2, 1, 3).reshape(B, S, H) @ params["wo"]
    h1 = x + attn
    hn = rmsnorm(h1, params["ln2"])
    gate = hn @ params["wg"]
    up = hn @ params["wu"]
    mlp = (jax.nn.silu(gate) * up) @ params["wd"]
    return h1 + mlp


if __name__ == "__main__":
    # Small Llama-like config.
    B, S, H = 2, 8, 64
    num_heads, num_kv_heads = 4, 2
    head_dim = H // num_heads
    I = 128
    rope_theta = 10000.0
    eps = 1e-6

    key = jax.random.PRNGKey(0)
    ks = jax.random.split(key, 9)
    scale = 0.02
    params = {
        "ln1": jnp.ones((1, H), jnp.float32),
        "ln2": jnp.ones((1, H), jnp.float32),
        "wq": scale * jax.random.normal(ks[0], (H, num_heads * head_dim), jnp.float32),
        "wk": scale * jax.random.normal(ks[1], (H, num_kv_heads * head_dim), jnp.float32),
        "wv": scale * jax.random.normal(ks[2], (H, num_kv_heads * head_dim), jnp.float32),
        "wo": scale * jax.random.normal(ks[3], (num_heads * head_dim, H), jnp.float32),
        "wg": scale * jax.random.normal(ks[4], (H, I), jnp.float32),
        "wu": scale * jax.random.normal(ks[5], (H, I), jnp.float32),
        "wd": scale * jax.random.normal(ks[6], (I, H), jnp.float32),
    }
    x = jax.random.normal(ks[7], (B, S, H), jnp.float32)

    # Rotary embedding cache (position_ids = arange(S)).
    inv_freq = 1.0 / (rope_theta ** (jnp.arange(0, head_dim, 2, dtype=jnp.float32) / head_dim))
    t = jnp.arange(S, dtype=jnp.float32)
    freqs = jnp.einsum("i,j->ij", t, inv_freq)
    emb = jnp.concatenate([freqs, freqs], axis=-1)
    cos, sin = jnp.cos(emb), jnp.sin(emb)          # (S, head_dim)

    out = llama_decoder_layer(x, params, cos, sin,
                              num_heads=num_heads, num_kv_heads=num_kv_heads, eps=eps)
    out = jax.block_until_ready(out)

    ref = reference(x, params, cos, sin,
                    num_heads=num_heads, num_kv_heads=num_kv_heads, eps=eps)
    # bf16 MXU operands (fp32 accumulation) vs fp32 reference -> relaxed tolerance.
    np.testing.assert_allclose(np.asarray(out), np.asarray(ref), rtol=5e-3, atol=5e-3)

    print("KERNEL_OK")
</pallas_src>

<mosaic_0001>
module attributes {stable_mosaic.version = 11 : i64} {
  func.func @_kv_kernel(%arg0: i32, %arg1: i32, %arg2: memref<1x8x64xf32, #tpu.memory_space<vmem>>, %arg3: memref<1x64xf32, #tpu.memory_space<vmem>>, %arg4: memref<64x64xbf16, #tpu.memory_space<vmem>>, %arg5: memref<8x16xf32, #tpu.memory_space<vmem>>, %arg6: memref<8x16xf32, #tpu.memory_space<vmem>>, %arg7: memref<1x2x8x16xbf16, #tpu.memory_space<vmem>>, %arg8: memref<1x2x8x16xbf16, #tpu.memory_space<vmem>>) attributes {dimension_semantics = [#tpu.dimension_semantics<parallel>, #tpu.dimension_semantics<parallel>], iteration_bounds = array<i64: 2, 1>, scalar_prefetch = 0 : i64, scratch_operands = 0 : i64, tpu.core_type = #tpu.core_type<tc>, window_params = [{transform_indices = @transform_0, window_bounds = array<i64: 1, 8, 64>}, {pipeline_mode = #tpu.pipeline_mode<synchronous>, transform_indices = @transform_1, window_bounds = array<i64: 1, 64>}, {pipeline_mode = #tpu.pipeline_mode<synchronous>, transform_indices = @transform_2, window_bounds = array<i64: 64, 64>}, {transform_indices = @transform_3, window_bounds = array<i64: 8, 16>}, {transform_indices = @transform_4, window_bounds = array<i64: 8, 16>}, {transform_indices = @transform_5, window_bounds = array<i64: 1, 2, 8, 16>}, {transform_indices = @transform_6, window_bounds = array<i64: 1, 2, 8, 16>}]} {
    %c0 = arith.constant 0 : index
    %c0_0 = arith.constant 0 : index
    %c0_1 = arith.constant 0 : index
    %0 = vector.load %arg2[%c0, %c0_0, %c0_1] : memref<1x8x64xf32, #tpu.memory_space<vmem>>, vector<1x8x64xf32>
    %1 = vector.shape_cast %0 : vector<1x8x64xf32> to vector<8x64xf32>
    %c0_2 = arith.constant 0 : index
    %c0_3 = arith.constant 0 : index
    %2 = vector.load %arg3[%c0_2, %c0_3] : memref<1x64xf32, #tpu.memory_space<vmem>>, vector<1x64xf32>
    %3 = arith.mulf %1, %1 : vector<8x64xf32>
    %cst = arith.constant dense<0.000000e+00> : vector<8xf32>
    %4 = vector.multi_reduction <add>, %3, %cst [1] : vector<8x64xf32> to vector<8xf32>
    %5 = vector.shape_cast %4 : vector<8xf32> to vector<8x1xf32>
    %cst_4 = arith.constant 6.400000e+01 : f32
    %6 = vector.broadcast %cst_4 : f32 to vector<8x1xf32>
    %7 = arith.divf %5, %6 : vector<8x1xf32>
    %cst_5 = arith.constant 9.99999997E-7 : f32
    %8 = vector.broadcast %cst_5 : f32 to vector<8x1xf32>
    %9 = arith.addf %7, %8 : vector<8x1xf32>
    %10 = math.rsqrt %9 : vector<8x1xf32>
    %11 = vector.broadcast %10 : vector<8x1xf32> to vector<8x64xf32>
    %12 = arith.mulf %1, %11 : vector<8x64xf32>
    %13 = vector.broadcast %2 : vector<1x64xf32> to vector<8x64xf32>
    %14 = arith.mulf %12, %13 : vector<8x64xf32>
    %15 = arith.truncf %14 : vector<8x64xf32> to vector<8x64xbf16>
    %c0_6 = arith.constant 0 : index
    %c0_7 = arith.constant 0 : index
    %16 = vector.load %arg4[%c0_6, %c0_7] : memref<64x64xbf16, #tpu.memory_space<vmem>>, vector<64x64xbf16>
    %cst_8 = arith.constant dense<0.000000e+00> : vector<8x64xf32>
    %17 = tpu.matmul %15, %16, %cst_8 {dimension_numbers = #tpu.dot_dimension_numbers<[1], [0], [0], [1], [0, 0, 1, 1], [], []>} : vector<8x64xbf16>, vector<64x64xbf16>, vector<8x64xf32> -> vector<8x64xf32>
    %c0_9 = arith.constant 0 : index
    %c0_10 = arith.constant 0 : index
    %18 = vector.load %arg5[%c0_9, %c0_10] : memref<8x16xf32, #tpu.memory_space<vmem>>, vector<8x16xf32>
    %c0_11 = arith.constant 0 : index
    %c0_12 = arith.constant 0 : index
    %19 = vector.load %arg6[%c0_11, %c0_12] : memref<8x16xf32, #tpu.memory_space<vmem>>, vector<8x16xf32>
    %20 = vector.extract_strided_slice %17 {offsets = [0, 0], sizes = [8, 16], strides = [1, 1]} : vector<8x64xf32> to vector<8x16xf32>
    %21 = arith.mulf %20, %18 : vector<8x16xf32>
    %22 = vector.extract_strided_slice %20 {offsets = [0, 8], sizes = [8, 8], strides = [1, 1]} : vector<8x16xf32> to vector<8x8xf32>
    %23 = vector.extract_strided_slice %20 {offsets = [0, 0], sizes = [8, 8], strides = [1, 1]} : vector<8x16xf32> to vector<8x8xf32>
    %24 = tpu.concatenate %22, %23 in 1 : vector<8x8xf32>, vector<8x8xf32> -> vector<8x16xf32>
    %25 = arith.mulf %24, %19 : vector<8x16xf32>
    %26 = arith.addf %21, %25 : vector<8x16xf32>
    %27 = arith.truncf %26 : vector<8x16xf32> to vector<8x16xbf16>
    %c0_13 = arith.constant 0 : index
    %c0_14 = arith.constant 0 : index
    %c0_15 = arith.constant 0 : index
    %c0_16 = arith.constant 0 : index
    %28 = vector.load %arg7[%c0_13, %c0_14, %c0_15, %c0_16] : memref<1x2x8x16xbf16, #tpu.memory_space<vmem>>, vector<1x1x8x16xbf16>
    %29 = vector.shape_cast %28 : vector<1x1x8x16xbf16> to vector<8x16xbf16>
    %30 = vector.shape_cast %27 : vector<8x16xbf16> to vector<1x1x8x16xbf16>
    tpu.vector_store %arg7[%c0_13, %c0_14, %c0_15, %c0_16], %30 {strides = array<i32>} : memref<1x2x8x16xbf16, #tpu.memory_space<vmem>>, vector<1x1x8x16xbf16>,
    %31 = vector.extract_strided_slice %17 {offsets = [0, 32], sizes = [8, 16], strides = [1, 1]} : vector<8x64xf32> to vector<8x16xf32>
    %32 = arith.truncf %31 : vector<8x16xf32> to vector<8x16xbf16>
    %c0_17 = arith.constant 0 : index
    %c0_18 = arith.constant 0 : index
    %c0_19 = arith.constant 0 : index
    %c0_20 = arith.constant 0 : index
    %33 = vector.load %arg8[%c0_17, %c0_18, %c0_19, %c0_20] : memref<1x2x8x16xbf16, #tpu.memory_space<vmem>>, vector<1x1x8x16xbf16>
    %34 = vector.shape_cast %33 : vector<1x1x8x16xbf16> to vector<8x16xbf16>
    %35 = vector.shape_cast %32 : vector<8x16xbf16> to vector<1x1x8x16xbf16>
    tpu.vector_store %arg8[%c0_17, %c0_18, %c0_19, %c0_20], %35 {strides = array<i32>} : memref<1x2x8x16xbf16, #tpu.memory_space<vmem>>, vector<1x1x8x16xbf16>,
    %36 = vector.extract_strided_slice %17 {offsets = [0, 16], sizes = [8, 16], strides = [1, 1]} : vector<8x64xf32> to vector<8x16xf32>
    %37 = arith.mulf %36, %18 : vector<8x16xf32>
    %38 = vector.extract_strided_slice %36 {offsets = [0, 8], sizes = [8, 8], strides = [1, 1]} : vector<8x16xf32> to vector<8x8xf32>
    %39 = vector.extract_strided_slice %36 {offsets = [0, 0], sizes = [8, 8], strides = [1, 1]} : vector<8x16xf32> to vector<8x8xf32>
    %40 = tpu.concatenate %38, %39 in 1 : vector<8x8xf32>, vector<8x8xf32> -> vector<8x16xf32>
    %41 = arith.mulf %40, %19 : vector<8x16xf32>
    %42 = arith.addf %37, %41 : vector<8x16xf32>
    %43 = arith.truncf %42 : vector<8x16xf32> to vector<8x16xbf16>
    %c0_21 = arith.constant 0 : index
    %c1 = arith.constant 1 : index
    %c0_22 = arith.constant 0 : index
    %c0_23 = arith.constant 0 : index
    %44 = vector.load %arg7[%c0_21, %c1, %c0_22, %c0_23] : memref<1x2x8x16xbf16, #tpu.memory_space<vmem>>, vector<1x1x8x16xbf16>
    %45 = vector.shape_cast %44 : vector<1x1x8x16xbf16> to vector<8x16xbf16>
    %46 = vector.shape_cast %43 : vector<8x16xbf16> to vector<1x1x8x16xbf16>
    tpu.vector_store %arg7[%c0_21, %c1, %c0_22, %c0_23], %46 {strides = array<i32>} : memref<1x2x8x16xbf16, #tpu.memory_space<vmem>>, vector<1x1x8x16xbf16>,
    %47 = vector.extract_strided_slice %17 {offsets = [0, 48], sizes = [8, 16], strides = [1, 1]} : vector<8x64xf32> to vector<8x16xf32>
    %48 = arith.truncf %47 : vector<8x16xf32> to vector<8x16xbf16>
    %c0_24 = arith.constant 0 : index
    %c1_25 = arith.constant 1 : index
    %c0_26 = arith.constant 0 : index
    %c0_27 = arith.constant 0 : index
    %49 = vector.load %arg8[%c0_24, %c1_25, %c0_26, %c0_27] : memref<1x2x8x16xbf16, #tpu.memory_space<vmem>>, vector<1x1x8x16xbf16>
    %50 = vector.shape_cast %49 : vector<1x1x8x16xbf16> to vector<8x16xbf16>
    %51 = vector.shape_cast %48 : vector<8x16xbf16> to vector<1x1x8x16xbf16>
    tpu.vector_store %arg8[%c0_24, %c1_25, %c0_26, %c0_27], %51 {strides = array<i32>} : memref<1x2x8x16xbf16, #tpu.memory_space<vmem>>, vector<1x1x8x16xbf16>,
    return
  }
  func.func @transform_0(%arg0: i32, %arg1: i32) -> (i32, i32, i32) {
    %c0_i32 = arith.constant 0 : i32
    %c0_i32_0 = arith.constant 0 : i32
    return %arg0, %arg1, %c0_i32 : i32, i32, i32
  }
  func.func @transform_1(%arg0: i32, %arg1: i32) -> (i32, i32) {
    %c0_i32 = arith.constant 0 : i32
    %c0_i32_0 = arith.constant 0 : i32
    %c0_i32_1 = arith.constant 0 : i32
    return %c0_i32, %c0_i32_0 : i32, i32
  }
  func.func @transform_2(%arg0: i32, %arg1: i32) -> (i32, i32) {
    %c0_i32 = arith.constant 0 : i32
    %c0_i32_0 = arith.constant 0 : i32
    %c0_i32_1 = arith.constant 0 : i32
    return %c0_i32, %c0_i32_0 : i32, i32
  }
  func.func @transform_3(%arg0: i32, %arg1: i32) -> (i32, i32) {
    %c0_i32 = arith.constant 0 : i32
    %c0_i32_0 = arith.constant 0 : i32
    return %arg1, %c0_i32 : i32, i32
  }
  func.func @transform_4(%arg0: i32, %arg1: i32) -> (i32, i32) {
    %c0_i32 = arith.constant 0 : i32
    %c0_i32_0 = arith.constant 0 : i32
    return %arg1, %c0_i32 : i32, i32
  }
  func.func @transform_5(%arg0: i32, %arg1: i32) -> (i32, i32, i32, i32) {
    %c0_i32 = arith.constant 0 : i32
    %c0_i32_0 = arith.constant 0 : i32
    %c0_i32_1 = arith.constant 0 : i32
    return %arg0, %c0_i32, %arg1, %c0_i32_0 : i32, i32, i32, i32
  }
  func.func @transform_6(%arg0: i32, %arg1: i32) -> (i32, i32, i32, i32) {
    %c0_i32 = arith.constant 0 : i32
    %c0_i32_0 = arith.constant 0 : i32
    %c0_i32_1 = arith.constant 0 : i32
    return %arg0, %c0_i32, %arg1, %c0_i32_0 : i32, i32, i32, i32
  }
}

</mosaic_0001>

<bundles_post_ra>
// kernel: tpu_custom_call.1
= control target key start
LH: loop header
LB: loop body
LE: loop exit
PB: predicated region body
PF: predicated region fallthrough
CT: control target
= control target key end

     0   :  { %s1426_s0 = inlined_call_operand.hbm [shape: f32[2,8,64], index: 0, kind: input, shape index: {}]   ;;  %s1427_s1 = inlined_call_operand.vmem [shape: f32[1,64], index: 1, kind: input, shape index: {}]   ;;  %s1428_s2 = inlined_call_operand.hbm [shape: bf16[64,64], index: 2, kind: input, shape index: {}]   ;;  %s1429_s3 = inlined_call_operand.vmem [shape: f32[8,16], index: 3, kind: input, shape index: {}]   ;;  %s1430_s4 = inlined_call_operand.hbm [shape: f32[8,16], index: 4, kind: input, shape index: {}]   ;;  %s1431_s5 = inlined_call_operand.hbm [shape: bf16[2,2,8,16], index: 5, kind: output, shape index: {0}]   ;;  %s1432_s6 = inlined_call_operand.hbm [shape: bf16[2,2,8,16], index: 6, kind: output, shape index: {1}]  }
   0x1   :  { %1438 = sst [smem:[#allocation16_spill]] %s1426_s0 }
   0x2   :  { %1439 = sst [smem:[#allocation17_spill]] %s1427_s1 }
   0x3   :  { %12 = vsyncpa [#allocation3], 0 }
   0x4   :  { %14 = vsyncpa [#allocation3 + $0x1], 0 }
   0x5   :  { %15 = vsyncpa [#allocation6], 0 }
   0x6   :  { %16 = vsyncpa [#allocation4], 0 }
   0x7   :  { %18 = vsyncpa [#allocation4 + $0x1], 0 }
   0x8   :  { %19 = vsyncpa [#allocation10], 0 }
   0x9   :  { %21 = vsyncpa [#allocation10 + $0x1], 0  ;;  %s1109_s21 = smov 0   ;;  %s1111_s22 = smov 0  }
   0xa   :  { %s1113_s23 = smov 0   ;;  %s1115_s24 = smov 0  }
   0xb   :  { %s1117_s25 = smov 0   ;;  %s1119_s26 = smov 0  }
   0xc LB: > { %s689_s27 = sadd.s32 4294967295, %s1054_s26   ;;  %s690_s28 = sadd.s32 4294967294, %s1054_s26   ;;  %s1054_s26 = sphi %s1119_s26, %s27_s26   ;;  %s1050_s25 = sphi %s1117_s25, %s1461_s25   ;;  %s1046_s24 = sphi %s1115_s24, %s1460_s24   ;;  %s1042_s23 = sphi %s1113_s23, %s1459_s23   ;;  %s1038_s22 = sphi %s1111_s22, %s1458_s22   ;;  %s1034_s21 = sphi %s1109_s21, %s1457_s21  }
   0xd   : > { %p61_p0 = scmp.ne.s32.totalorder %s1038_s22, %s1034_s21  ;;  %p1143_p1 = scmp.eq.s32.totalorder %s689_s27, 0 }
   0xe   : > { %p1147_p2 = scmp.eq.s32.totalorder %s689_s27, 1  ;;  %p187_p3 = scmp.eq.s32.totalorder %s690_s28, 1 }
   0xf   : > { %s1440_s29 = scalar_select %p1143_p1, 1, 0 }
  0x10   : > { %p1153_p4 = por %p1143_p1, %p61_p0  ;;  %p691_p5 = scmp.ge.s32.totalorder %s1054_s26, 1 }
  0x11   : > { %p1158_p6 = por %p187_p3, %p61_p0  ;;  %p222_p7 = scmp.lt.s32.totalorder %s1054_s26, 3 }
  0x12   : > { %s1442_s7 = scalar_select %p1153_p4, 1, 0 }
  0x13   : > { %s1443_s8 = scalar_select %p1158_p6, 1, 0 }
  0x14   : > { %p1163_p8 = pnand %p691_p5, %p222_p7  ;;  %s1056_s10 = smov [#allocation5]  }
  0x15   : > { %1444 = sst [smem:[#allocation15_spill]] %s1443_s8  ;;  %s237_s11 = sshll.u32 %s1056_s10, 4  ;;  %s1167_s11 = int_to_ptr.vmem [resolvable:$true] %s237_s11 }
  0x16   : > { %p757_p9 = pneg %p1163_p8  ;;  %s1057_s13 = smov [#allocation7]  }
  0x17   : > { %s260_s14 = sshll.u32 %s1057_s13, 4  ;;  %s850_s17 = scalar_lea.hbm %s1428_s2, 512  ;;  %s1178_s14 = int_to_ptr.vmem [resolvable:$true] %s260_s14 }
  0x18   : > { %p1174_p11 = pnand %p757_p9, %p1143_p1  ;;  %p851_p12 = scmp.ne.s32.totalorder %s1428_s2, %s850_s17 }
  0x19   : > { %p857_p5 = scmp.lt.u32.totalorder %s850_s17, %s1428_s2 }
  0x1a   : > { %p852_p13 = pneg %p1174_p11 }
  0x1c   : > { %p853_p0 = pnand %p852_p13, %p851_p12 }
  0x1e   : > { %p854_p3 = pneg %p853_p0 }
  0x20   : > { %p859_p7 = pnand %p857_p5, %p854_p3 }
  0x22   : > { %862 = shalt.err (!%p859_p7)
}
  0x23   : > { %s863_s28 = scalar_lea.vmem %s1167_s11, 512  ;;  %p871_p1 = scmp.lt.s32.totalorder %s1167_s11, %s1167_s11 }
  0x24   : > { %p864_p9 = scmp.ne.s32.totalorder %s1167_s11, %s863_s28  ;;  %p872_p12 = scmp.lt.s32.totalorder %s863_s28, %s863_s28 }
  0x26   : > { %p866_p10 = pnand %p864_p9, %p852_p13  ;;  %p873_p0 = por %p872_p12, %p871_p1 }
  0x28   : > { %p867_p6 = pneg %p866_p10 }
  0x2a   : > { %p874_p4 = pnand %p873_p0, %p867_p6 }
  0x2c   : > { %877 = shalt.err (!%p874_p4)
}
  0x2d   : > { %s1058_s10 = smov 64   ;;  %s1059_s13 = smov 4  }
  0x2e   : > { %760 = dma.hbm_to_vmem [thread:$0]  (!%p1174_p11), %s1428_s2, 512, %s1167_s11, [#allocation6], %s1058_s10, %s1058_s10, %s1059_s13  }
  0x2f   : > { %s878_s19 = scalar_lea.hbm %s1430_s4, 128 }
  0x30   : > { %p879_p1 = scmp.ne.s32.totalorder %s1430_s4, %s878_s19  ;;  %p885_p10 = scmp.lt.u32.totalorder %s878_s19, %s1430_s4 }
  0x32   : > { %p881_p4 = pnand %p879_p1, %p852_p13 }
  0x34   : > { %p882_p6 = pneg %p881_p4 }
  0x36   : > { %p887_p3 = pnand %p885_p10, %p882_p6 }
  0x38   : > { %890 = shalt.err (!%p887_p3)
}
  0x39   : > { %s891_s11 = scalar_lea.vmem %s1178_s14, 128  ;;  %p899_p12 = scmp.lt.s32.totalorder %s1178_s14, %s1178_s14 }
  0x3a   : > { %p892_p5 = scmp.ne.s32.totalorder %s1178_s14, %s891_s11  ;;  %p900_p0 = scmp.lt.s32.totalorder %s891_s11, %s891_s11 }
  0x3c   : > { %p894_p7 = pnand %p892_p5, %p852_p13  ;;  %p901_p1 = por %p900_p0, %p899_p12 }
  0x3e   : > { %p895_p9 = pneg %p894_p7 }
  0x40   : > { %p902_p4 = pnand %p901_p1, %p895_p9 }
  0x42   : > { %905 = shalt.err (!%p902_p4)
}
  0x43   : > { %763 = dma.hbm_to_vmem [thread:$0]  (!%p1174_p11), %s1430_s4, 128, %s1178_s14, [#allocation6]  }
  0x44   : > { %s39_s13 = sadd.s32 1, %s1050_s25  ;;  %s48_s15 = sadd.s32 1, %s1042_s23 }
  0x45   : > { %p41_p13 = scmp.ge.s32.totalorder %s39_s13, 2  ;;  %p55_p6 = scmp.ne.s32.totalorder %s1042_s23, %s1038_s22 }
  0x46   : > { %p56_p10 = scmp.eq.s32.totalorder %s1054_s26, 0  ;;  %p777_p3 = scmp.lt.s32.totalorder %s1054_s26, 2 }
  0x47   : > { %s1463_s13 = smov (%p41_p13, %s39_s13), 0  ;;  %p1242_p7 = por %p1147_p2, %p55_p6 }
  0x48   : > { %p57_p5 = por %p56_p10, %p55_p6  ;;  %s43_s16 = ssub.s32 %s1050_s25, %s1463_s13 }
  0x49   : > { %s1447_s12 = scalar_select %p1242_p7, 1, 0 }
  0x4a   : > { %s271_s17 = sand.u32 1, %s1042_s23   ;;  %p46_p9 = scmp.eq.s32.totalorder %s43_s16, 0 }
  0x4b   : > { %s696_s14 = sshll.u32 %s271_s17, 3  ;;  %s697_s18 = sshll.u32 %s1050_s25, 7 }
  0x4c   : > { %s1251_s19 = scalar_select %p46_p9, %s1042_s23, %s48_s15  }
  0x4d   : > { %s1448_s0 = sld [smem:[#allocation16_spill]]  ;;  %s275_s30 = scalar_lea.vmem [#allocation2], %s696_s14 }
  0x4e   : > { %s283_s11 = sshll.u32 %s275_s30, 4  ;;  %p1260_p2 = pnand %p777_p3, %p57_p5  ;;  %s1264_s11 = int_to_ptr.vmem [resolvable:$true] %s283_s11 }
  0x4f   : > { %s272_s10 = scalar_lea.sflag [#allocation3], %s271_s17 }
  0x50   : > { %p908_p12 = pneg %p1260_p2 }
  0x53   : > { %s1256_s28 = scalar_lea.hbm %s1448_s0, %s697_s18  ;;  %s911_s18 = scalar_lea.hbm %s1448_s0, 256 }
  0x54   : > { %s906_s15 = scalar_lea.hbm %s1256_s28, 128  ;;  %p912_p4 = scmp.lt.u32.totalorder %s1256_s28, %s1448_s0 }
  0x55   : > { %p907_p11 = scmp.ne.s32.totalorder %s1256_s28, %s906_s15  ;;  %p913_p13 = scmp.lt.u32.totalorder %s911_s18, %s906_s15 }
  0x56   : > { %p915_p10 = scmp.lt.u32.totalorder %s906_s15, %s1256_s28 }
  0x57   : > { %p909_p0 = pnand %p908_p12, %p907_p11  ;;  %p914_p6 = por %p913_p13, %p912_p4 }
  0x59   : > { %p910_p1 = pneg %p909_p0  ;;  %p916_p3 = por %p915_p10, %p914_p6 }
  0x5b   : > { %p917_p5 = pnand %p916_p3, %p910_p1 }
  0x5d   : > { %920 = shalt.err (!%p917_p5)
}
  0x5e   : > { %s921_s17 = scalar_lea.vmem %s1264_s11, 128  ;;  %s1060_s30 = smov [#allocation2]  }
  0x5f   : > { %p922_p9 = scmp.ne.s32.totalorder %s1264_s11, %s921_s17  ;;  %s926_s16 = sshll.u32 %s1060_s30, 4  ;;  %s927_s16 = int_to_ptr.vmem [resolvable:$false] %s926_s16 }
  0x60   : > { %s928_s14 = scalar_lea.vmem %s927_s16, 256  ;;  %p929_p7 = scmp.lt.s32.totalorder %s1264_s11, %s927_s16 }
  0x61   : > { %p924_p11 = pnand %p922_p9, %p908_p12  ;;  %p930_p4 = scmp.lt.s32.totalorder %s928_s14, %s921_s17 }
  0x63   : > { %p925_p0 = pneg %p924_p11  ;;  %p931_p13 = por %p930_p4, %p929_p7 }
  0x65   : > { %p932_p6 = pnand %p931_p13, %p925_p0 }
  0x67   : > { %935 = shalt.err (!%p932_p6)
}
  0x68   : > { %767 = dma.hbm_to_vmem [thread:$0]  (!%p1260_p2), %s1256_s28, 128, %s1264_s11, %s272_s10  }
  0x69   : > { %292 = sbr.rel (%p1163_p8) target bundleno = 885 (0x375), region = 40  ;;  %s1294_s15 = sand.u32 (!%p1163_p8), 1, %s1038_s22  }
  0x6a   : > { %s1297_s18 = sshll.u32 (!%p1163_p8), %s1294_s15, 3  ;;  %s295_s20 = scalar_lea.sflag (!%p1163_p8), [#allocation3], %s1294_s15 }
  0x6b   : > { %s298_s27 = scalar_lea.vmem (!%p1163_p8), [#allocation2], %s1297_s18  ;;  %p1450_p7 = scmp.ne.s32.totalorder (!%p1163_p8), %s1442_s7, 0 }
  0x70   : > { %1017 = dma.done.wait (%p1450_p7), %s295_s20, 128  }
  0x71   : > { %1019 = vsyncadd (%p1450_p7), %s295_s20, 4294967168  ;;  %p1451_p2 = scmp.ne.s32.totalorder %s1440_s29, 0 }
  0x73   : > { %1021 = dma.done.wait (%p1451_p2), [#allocation6], 640  }
  0x74   : > { %1023 = vsyncadd (%p1451_p2), [#allocation6], 4294966656  ;;  %v349_v0 = vld [vmem:[%s298_s27] sm:$0xff]  ;;  %vm352_vm0 = vcmask 523264   ;;  %v844_v3 = vld [vmem:[#allocation5] sm:$0xff]   ;;  %v1061_v4 = vmov 0.0  }
  0x75   : > { %v351_v1 = vmul.f32 %v349_v0, %v349_v0  ;;  %731 = vmatprep.subr.bf16.mxu0 %v1061_v4  ;;  %vm1062_vm1 = vmmov 0   ;;  %v845_v5 = vld [vmem:[#allocation5 + $0x8] sm:$0xff]   ;;  %v846_v6 = vld [vmem:[#allocation5 + $0x10] sm:$0xff]   ;;  %v847_v7 = vld [vmem:[#allocation5 + $0x18] sm:$0xff]   ;;  %s1452_s1 = sld [smem:[#allocation17_spill]]  ;;  %s1063_s11 = smov 104  }
  0x76   : > { %739 = vmatprep.mubr.msk.bf16.mxu0 %vm1062_vm1, %v1061_v4  ;;  %732 = vmatpush3.bf16.msra.mxu0 %v844_v3  ;;  %v444_v16 = vld [vmem:[%s1429_s3] sm:$0xff]  ;;  %s1064_s8 = smov 120   ;;  %s1065_s10 = smov 16   ;;  %vm454_vm2 = vcmask 64512   ;;  %v445_v22 = vld [vmem:[#allocation7] sm:$0xff]  ;;  %vm459_vm3 = vcmask 125952  }
  0x77   : > { %v353_v2 = vsel %vm352_vm0, %v351_v1, 0.0  ;;  %733 = vmatprep.subr.bf16.mxu0 %v1061_v4  ;;  %s1066_s17 = smov 8   ;;  %s1067_s30 = smov 96  }
  0x78   : > { %354 = vadd.xlane.f32.xlu0 %v353_v2  ;;  %s1068_s16 = smov 112   ;;  %s1320_s14 = scalar_lea.vmem [#allocation9], %s1297_s18 }
  0x79   : > { %s1069_s20 = smov 80   ;;  %s336_s27 = scalar_lea.vmem [#allocation8], %s1297_s18 }
  0x7a   : > { %734 = vmatpush3.bf16.msra.mxu0 %v845_v5  ;;  %s518_s29 = sshll.u32 %s336_s27, 4  ;;  %s724_s7 = sshll.u32 %s1046_s24, 7  ;;  %s1328_s29 = int_to_ptr.vmem [resolvable:$true] %s518_s29 }
  0x7b   : > { %735 = vmatprep.subr.bf16.mxu0 %v1061_v4  ;;  %v704_v12 = vld [vmem:[%s1452_s1] ss:$0 sm:$0xff]  ;;  %s535_s9 = sshll.u32 %s1320_s14, 4  ;;  %s499_s18 = scalar_lea.sflag [#allocation4], %s1294_s15  ;;  %s1337_s9 = int_to_ptr.vmem [resolvable:$true] %s535_s9 }
  0x7c   : > { %p1453_p12 = scmp.ne.s32.totalorder %s1447_s12, 0 }
  0x7e   : > { %736 = vmatpush3.bf16.msra.mxu0 %v846_v6 }
  0x7f   : > { %737 = vmatprep.subr.bf16.mxu0 %v1061_v4 }
  0x82   : > { %738 = vmatpush3.bf16.msra.mxu0 %v847_v7 }
 0x105   : > { %v355_v8 = vpop.xlane.xlu0 %354 }
 0x106   : > { %v357_v9 = vmul.f32 0.015625, %v355_v8 }
 0x108   : > { %v358_v10 = vadd.f32 1e-06, %v357_v9 }
 0x10a   : > { %848 = vrsqrt.f32 %v358_v10 }
 0x114   : > { %v849_v11 = vpop.eup %848 }
 0x115   : > { %v360_v13 = vmul.f32 %v849_v11, %v349_v0 }
 0x117   : > { %v367_v14 = vmul.f32 %v704_v12, %v360_v13 }
 0x119   : > { %v368_v15 = vpack.c.bf16 %v367_v14, %v367_v14 }
 0x11b   : > { %740 = vmatmul.mubr.msk.bf16.vlgmr.msra.gmra.mrb[0].mxu0 %vm352_vm0, %v368_v15 }
 0x1ee   : > { %v438_v17 = vpop.f32.mrb[0].mxu0 }
 0x1ef   : > { %474 = vrot.lane.b32.xlu1 %v438_v17, %s1063_s11  ;;  %448 = vrot.lane.b32.xlu0 %v438_v17, %s1064_s8  ;;  %v741_v18 = vpop.f32.mrb[1].mxu0  ;;  %v446_v19 = vmul.f32 %v444_v16, %v438_v17  ;;  %v722_v27 = vpack.c.bf16 %v438_v17, %v438_v17  ;;  %s1335_s8 = scalar_lea.hbm %s1431_s5, %s724_s7 }
 0x1f0   : > { %v441_v20 = vpop.f32.mrb[2].mxu0 }
 0x1f1   : > { %v742_v21 = vpop.f32.mrb[3].mxu0 }
 0x1f3   : > { %470 = vrot.lane.b32.xlu1 %v444_v16, %s1065_s10 }
 0x261   : > { %v475_v23 = vpop.permute.xlu1 %474  ;;  %v449_v24 = vpop.permute.xlu0 %448 }
 0x262   : > { %v477_v25 = vsel %vm454_vm2, %v475_v23, %v449_v24 }
 0x263   : > { %v478_v26 = vmul.f32 %v477_v25, %v445_v22 }
 0x265   : > { %480 = vrot.lane.b32.xlu1 %v478_v26, %s1065_s10  ;;  %v471_v28 = vpop.permute.xlu1 %470  ;;  %s936_s10 = scalar_lea.vmem %s1328_s29, 128 }
 0x266   : > { %v473_v29 = vmul.f32 %v471_v28, %v438_v17  ;;  %p937_p8 = scmp.ne.s32.totalorder %s1328_s29, %s936_s10 }
 0x268   : > { %p938_p1 = pnand %p937_p8, %p1453_p12 }
 0x269   : > { %451 = vrot.lane.b32.xlu1 %v438_v17, %s1066_s17  ;;  %s1070_s17 = smov [#allocation8]  }
 0x26a   : > { %p939_p10 = pneg %p938_p1 }
 0x26d   : > { %465 = vrot.lane.b32.xlu1 %v722_v27, %s1067_s30  ;;  %s940_s30 = sshll.u32 %s1070_s17, 4  ;;  %s941_s30 = int_to_ptr.vmem [resolvable:$false] %s940_s30 }
 0x26e   : > { %p943_p3 = scmp.lt.s32.totalorder %s1328_s29, %s941_s30 }
 0x2d7   : > { %v481_v30 = vpop.permute.xlu1 %480 }
 0x2d8   : > { %v483_v31 = vadd.f32 %v481_v30, %v473_v29 }
 0x2da   : > { %v723_v32 = vpack.c.bf16 %v483_v31, %v483_v31 }
 0x2db   : > { %v452_v33 = vpop.permute.xlu1 %451 }
 0x2dc   : > { %v455_v34 = vsel %vm454_vm2, %v449_v24, %v452_v33  ;;  %488 = vrot.lane.b32.xlu1 %v723_v32, %s1068_s16  ;;  %s942_s16 = scalar_lea.vmem %s941_s30, 256 }
 0x2dd   : > { %v456_v35 = vmul.f32 %v455_v34, %v445_v22  ;;  %p944_p5 = scmp.lt.s32.totalorder %s942_s16, %s936_s10 }
 0x2df   : > { %v457_v36 = vadd.f32 %v456_v35, %v446_v19  ;;  %v466_v37 = vpop.permute.xlu1 %465  ;;  %p945_p9 = por %p944_p5, %p943_p3 }
 0x2e0   : > { %468 = vst.msk [vmem:[%s1320_s14] sm:$0xf] %vm459_vm3, %v466_v37  ;;  %493 = vrot.lane.b32.xlu1 %v722_v27, %s1069_s20 }
 0x2e1   : > { %v458_v38 = vpack.c.bf16 %v457_v36, %v457_v36  ;;  %p946_p11 = pnand %p945_p9, %p939_p10 }
 0x2e3   : > { %460 = vst.msk [vmem:[%s336_s27] sm:$0xf] %vm459_vm3, %v458_v38 }
 0x34e   : > { %v489_v39 = vpop.permute.xlu1 %488 }
 0x34f   : > { %712 = vst.msk [vmem:[%s336_s27 + $0x4] sm:$0xf] %vm459_vm3, %v489_v39 }
 0x350   : > { %949 = shalt.err (!%p946_p11)
}
 0x351   : > { %s950_s20 = scalar_lea.hbm %s1335_s8, 128  ;;  %s954_s11 = scalar_lea.hbm %s1431_s5, 256 }
 0x352   : > { %p951_p0 = scmp.ne.s32.totalorder %s1335_s8, %s950_s20  ;;  %p955_p6 = scmp.lt.u32.totalorder %s1335_s8, %s1431_s5 }
 0x353   : > { %p956_p7 = scmp.lt.u32.totalorder %s954_s11, %s950_s20  ;;  %p958_p8 = scmp.lt.u32.totalorder %s950_s20, %s1335_s8 }
 0x354   : > { %p952_p4 = pnand %p951_p0, %p1453_p12 }
 0x355   : > { %p957_p2 = por %p956_p7, %p955_p6 }
 0x356   : > { %p953_p13 = pneg %p952_p4 }
 0x357   : > { %p959_p1 = por %p958_p8, %p957_p2 }
 0x359   : > { %p960_p10 = pnand %p959_p1, %p953_p13 }
 0x35b   : > { %963 = shalt.err (!%p960_p10)
}
 0x35c   : > { %s1071_s10 = smov 64   ;;  %s1072_s16 = smov 4   ;;  %v494_v40 = vpop.permute.xlu1 %493 }
 0x35d   : > { %753 = dma.vmem_to_hbm [thread:$0]  (%p1453_p12), %s1328_s29, 128, %s1335_s8, %s499_s18, %s1071_s10, %s1071_s10, %s1072_s16  }
 0x35e   : > { %s1372_s28 = scalar_lea.hbm %s1432_s6, %s724_s7  ;;  %713 = vst.msk [vmem:[%s1320_s14 + $0x4] sm:$0xf] %vm459_vm3, %v494_v40  ;;  %s504_s11 = scalar_lea.sflag [#allocation10], %s1294_s15 }
 0x35f   : > { %s964_s17 = scalar_lea.vmem %s1337_s9, 128  ;;  %s1073_s30 = smov [#allocation9]  }
 0x360   : > { %p965_p3 = scmp.ne.s32.totalorder %s1337_s9, %s964_s17  ;;  %s968_s0 = sshll.u32 %s1073_s30, 4  ;;  %s969_s0 = int_to_ptr.vmem [resolvable:$false] %s968_s0 }
 0x361   : > { %s970_s1 = scalar_lea.vmem %s969_s0, 256  ;;  %p971_p11 = scmp.lt.s32.totalorder %s1337_s9, %s969_s0 }
 0x362   : > { %p966_p5 = pnand %p965_p3, %p1453_p12  ;;  %p972_p0 = scmp.lt.s32.totalorder %s970_s1, %s964_s17 }
 0x364   : > { %p967_p9 = pneg %p966_p5  ;;  %p973_p4 = por %p972_p0, %p971_p11 }
 0x366   : > { %p974_p13 = pnand %p973_p4, %p967_p9 }
 0x368   : > { %977 = shalt.err (!%p974_p13)
}
 0x369   : > { %s978_s24 = scalar_lea.hbm %s1372_s28, 128  ;;  %s982_s7 = scalar_lea.hbm %s1432_s6, 256 }
 0x36a   : > { %p979_p6 = scmp.ne.s32.totalorder %s1372_s28, %s978_s24  ;;  %p983_p8 = scmp.lt.u32.totalorder %s1372_s28, %s1432_s6 }
 0x36b   : > { %p984_p1 = scmp.lt.u32.totalorder %s982_s7, %s978_s24  ;;  %p986_p3 = scmp.lt.u32.totalorder %s978_s24, %s1372_s28 }
 0x36c   : > { %p980_p7 = pnand %p979_p6, %p1453_p12 }
 0x36d   : > { %p985_p10 = por %p984_p1, %p983_p8 }
 0x36e   : > { %p981_p2 = pneg %p980_p7 }
 0x36f   : > { %p987_p5 = por %p986_p3, %p985_p10 }
 0x371   : > { %p988_p9 = pnand %p987_p5, %p981_p2 }
 0x373   : > { %991 = shalt.err (!%p988_p9)
}
 0x374   : > { %754 = dma.vmem_to_hbm [thread:$0]  (%p1453_p12), %s1337_s9, 128, %s1372_s28, %s504_s11, %s1071_s10, %s1071_s10, %s1072_s16  }
 0x375 PF: > { %s1454_s1 = sld [smem:[#allocation15_spill]]  ;;  %s550_s18 = sand.u32 1, %s1034_s21  }
 0x376   : > { %p1456_p0 = scmp.ge.s32.totalorder %s1054_s26, 2  ;;  %s551_s20 = scalar_lea.sflag [#allocation4], %s550_s18 }
 0x37b   : > { %p1455_p11 = scmp.ne.s32.totalorder %s1454_s1, 0 }
 0x37d   : > { %p769_p4 = pnand %p1456_p0, %p1455_p11 }
 0x37f   : > { %1025 = dma.done.wait (!%p769_p4), %s551_s20, 128  }
 0x380   : > { %1027 = vsyncadd (!%p769_p4), %s551_s20, 4294967168  ;;  %s560_s12 = scalar_lea.sflag [#allocation10], %s550_s18 }
 0x381   : > { %1029 = dma.done.wait (!%p769_p4), %s560_s12, 128  }
 0x382   : > { %1031 = vsyncadd (!%p769_p4), %s560_s12, 4294967168  ;;  %s27_s26 = sadd.s32 1, %s1054_s26   ;;  %s1457_s21 = smov %s1038_s22 }
 0x383   : > { %p24_p13 = scmp.ge.s32.totalorder %s27_s26, 4   ;;  %s1458_s22 = smov %s1042_s23 }
 0x384   : > { %s1459_s23 = smov %s1251_s19  ;;  %s1460_s24 = smov %s1050_s25 }
 0x385   : > { %s1461_s25 = smov %s1463_s13  ;;  %26 = sbr.rel (!%p24_p13) target bundleno = 12 (0xc), region = 116 }
 0x38c   :  { %565 = vsyncpa [#allocation3], 1 }
 0x38d   :  { %567 = vsyncpa [#allocation3 + $0x1], 1 }
 0x38e   :  { %568 = vsyncpa [#allocation6], 1 }
 0x38f   :  { %569 = vsyncpa [#allocation4], 1 }
 0x390   :  { %571 = vsyncpa [#allocation4 + $0x1], 1 }
 0x391   :  { %572 = vsyncpa [#allocation10], 1 }
 0x392   :  { %574 = vsyncpa [#allocation10 + $0x1], 1 }

</bundles_post_ra>
